<compile_context>
chip_gen: v7x
topology: tpu7x:2x2x1
jax: 0.10.0
libtpu: 0.0.40
codegen_flags: <defaults>
</compile_context>

<pallas_src>
import functools

import jax
import jax.numpy as jnp
from jax.experimental import pallas as pl
from jax.experimental.pallas import tpu as pltpu


def _round_up(n, m):
    return ((n + m - 1) // m) * m


def _cdiv(a, b):
    return -(-a // b)


_CompilerParams = getattr(pltpu, "CompilerParams", None) or getattr(
    pltpu, "TPUCompilerParams")


def _block_spec(shape, index_map, single_buffer=False):
    """BlockSpec; single-buffer constant-index operands when supported."""
    if single_buffer and hasattr(pl, "Buffered"):
        try:
            return pl.BlockSpec(shape, index_map, pipeline_mode=pl.Buffered(1))
        except TypeError:  # older jax without pipeline_mode kwarg
            pass
    return pl.BlockSpec(shape, index_map)


def _vmem_ceiling_bytes():
    cap = None
    if hasattr(pltpu, "get_tpu_info"):
        try:
            cap = getattr(pltpu.get_tpu_info(), "vmem_capacity_bytes", None)
        except Exception:
            cap = None
    if not cap:
        cap = 64 << 20  # conservative fallback: valid on v5e/v6e/v7x alike
    return int(cap * 0.85)


def ffn_kernel(x_ref, mask_ref, gamma_ref, beta_ref, w1_ref, b1_ref, w2_ref,
               b2_ref, o_ref, xn_ref, acc_ref, *, d_in, apply_mask):
    k = pl.program_id(1)
    nk = pl.num_programs(1)

    @pl.when(k == 0)
    def _():
        # LayerNorm in f32 over the real d_in lanes; done once per row tile.
        x = x_ref[...].astype(jnp.float32)
        mean = jnp.sum(x, axis=-1, keepdims=True) * (1.0 / d_in)
        centered = x - mean
        if apply_mask:
            centered = centered * mask_ref[...].astype(jnp.float32)
        var = jnp.sum(centered * centered, axis=-1, keepdims=True) * (1.0 / d_in)
        xn = centered * jax.lax.rsqrt(var + 1e-6)
        xn = (xn * gamma_ref[...].astype(jnp.float32)
              + beta_ref[...].astype(jnp.float32))
        xn_ref[...] = xn.astype(xn_ref.dtype)          # bf16 MXU operand
        acc_ref[...] = jnp.zeros_like(acc_ref)

    # One d_hid chunk: h_k = relu(xn @ w1[:, k] + b1[k]); acc += h_k @ w2[k, :]
    h = jnp.dot(xn_ref[...], w1_ref[...], preferred_element_type=jnp.float32)
    h = jnp.maximum(h + b1_ref[...].astype(jnp.float32), 0.0)
    acc_ref[...] += jnp.dot(h.astype(w2_ref.dtype), w2_ref[...],
                            preferred_element_type=jnp.float32)

    @pl.when(k == nk - 1)
    def _():
        y = acc_ref[...] + b2_ref[...].astype(jnp.float32)
        # Residual: reload the x tile (a VMEM vld that hides under the MXU)
        # instead of keeping an f32 copy live across both matmuls.
        o_ref[...] = (y + x_ref[...].astype(jnp.float32)).astype(o_ref.dtype)


def positionwise_ffn4(x, gamma, beta, w1, b1, w2, b2, *, tm=512, k_chunk=2048):
    """x: (B, S, d_in) -> (B, S, d_in). Eval-mode forward (dropout = identity)."""
    B, S, d_in = x.shape
    d_hid = w1.shape[1]
    rows = B * S

    mxu_dtype = jnp.bfloat16 if x.dtype == jnp.float32 else x.dtype

    # ---- feature padding (lane-dense multiples of 128) and d_hid k-tiling plan.
    d_in_p = _round_up(d_in, 128)
    d_hid_128 = _round_up(d_hid, 128)
    nk = max(1, _cdiv(d_hid_128, k_chunk))
    tk = _round_up(_cdiv(d_hid_128, nk), 128)
    d_hid_p = tk * nk

    # ---- row tile: at least 2 parallel grid steps when rows allow (v7x: 2 TCs).
    tm_eff = max(8, min(tm, _round_up(max(_cdiv(rows, 2), 8), 8)))

    it_x = jnp.dtype(x.dtype).itemsize
    it_w = jnp.dtype(mxu_dtype).itemsize

    def need_bytes(tm_):
        w_buf = 1 if nk == 1 else 2                            # weight chunk buffers
        w_bytes = w_buf * (2 * d_in_p * tk + tk) * it_w        # w1 + w2 + b1 chunks
        act_io = 2 * 2 * tm_ * d_in_p * it_x                   # x/out, double-buffered
        scratch = tm_ * d_in_p * (it_w + 4)                    # xn (bf16) + acc (f32)
        tmps = tm_ * tk * (4 + it_w) + 3 * tm_ * d_in_p * 4    # h + cast + LN temps
        vecs = 6 * 4 * max(d_in_p, tk)
        return w_bytes + act_io + scratch + tmps + vecs + (8 << 20)

    ceiling = _vmem_ceiling_bytes()
    while need_bytes(tm_eff) > ceiling and tm_eff > 64:
        tm_eff = max(64, _round_up(tm_eff // 2, 8))
    vmem_limit = int(min(max(need_bytes(tm_eff), 32 << 20), ceiling))

    rows_p = _round_up(rows, tm_eff)
    pad_r, pad_i, pad_h = rows_p - rows, d_in_p - d_in, d_hid_p - d_hid

    # ---- operand prep. Under jit these fold into the call; in real deployments
    #      pad/cast the weights once at load time, outside the per-call path.
    x2d = x.reshape(rows, d_in)
    if pad_r or pad_i:
        x2d = jnp.pad(x2d, ((0, pad_r), (0, pad_i)))

    def pad_vec(v, width, pad):
        v2 = v.reshape(1, width)
        return jnp.pad(v2, ((0, 0), (0, pad))) if pad else v2

    gamma2d = pad_vec(gamma, d_in, pad_i)
    beta2d = pad_vec(beta, d_in, pad_i)
    b1_2d = pad_vec(b1, d_hid, pad_h)
    b2_2d = pad_vec(b2, d_in, pad_i)
    mask2d = (jnp.arange(d_in_p, dtype=jnp.int32) < d_in).astype(
        jnp.float32).reshape(1, d_in_p)

    w1_p = w1.astype(mxu_dtype)
    w2_p = w2.astype(mxu_dtype)
    if pad_i or pad_h:
        w1_p = jnp.pad(w1_p, ((0, pad_i), (0, pad_h)))
        w2_p = jnp.pad(w2_p, ((0, pad_h), (0, pad_i)))

    kernel = functools.partial(ffn_kernel, d_in=d_in, apply_mask=(pad_i != 0))

    def run(allow_single_buffer):
        sb_const = allow_single_buffer
        sb_weight = allow_single_buffer and (nk == 1)
        return pl.pallas_call(
            kernel,
            out_shape=jax.ShapeDtypeStruct((rows_p, d_in_p), x.dtype),
            grid_spec=pltpu.PrefetchScalarGridSpec(
                num_scalar_prefetch=0,
                grid=(rows_p // tm_eff, nk),
                in_specs=[
                    pl.BlockSpec((tm_eff, d_in_p), lambda i, k: (i, 0)),        # x
                    _block_spec((1, d_in_p), lambda i, k: (0, 0), sb_const),    # mask
                    _block_spec((1, d_in_p), lambda i, k: (0, 0), sb_const),    # gamma
                    _block_spec((1, d_in_p), lambda i, k: (0, 0), sb_const),    # beta
                    _block_spec((d_in_p, tk), lambda i, k: (0, k), sb_weight),  # w1
                    _block_spec((1, tk), lambda i, k: (0, k), sb_weight),       # b1
                    _block_spec((tk, d_in_p), lambda i, k: (k, 0), sb_weight),  # w2
                    _block_spec((1, d_in_p), lambda i, k: (0, 0), sb_const),    # b2
                ],
                out_specs=pl.BlockSpec((tm_eff, d_in_p), lambda i, k: (i, 0)),
                scratch_shapes=[
                    pltpu.VMEM((tm_eff, d_in_p), mxu_dtype),    # xn (LN output)
                    pltpu.VMEM((tm_eff, d_in_p), jnp.float32),  # 2nd matmul acc
                ],
            ),
            compiler_params=_CompilerParams(
                dimension_semantics=("parallel", "arbitrary"),
                vmem_limit_bytes=vmem_limit,
            ),
        )(x2d, mask2d, gamma2d, beta2d, w1_p, b1_2d, w2_p, b2_2d)

    try:
        out2d = run(True)
    except Exception:
        # Fallback for jax/Mosaic versions that reject pl.Buffered(1).
        out2d = run(False)

    if pad_r or pad_i:
        out2d = out2d[:rows, :d_in]
    return out2d.reshape(B, S, d_in)


if __name__ == "__main__":
    B, S, d_in, d_hid = 2, 8, 32, 64

    key = jax.random.PRNGKey(0)
    kx, k1, k2, k3, k4 = jax.random.split(key, 5)

    x = jax.random.normal(kx, (B, S, d_in), dtype=jnp.float32)

    # Deterministic synthetic parameters matching the module shapes.
    w1 = jax.random.normal(k1, (d_in, d_hid), dtype=jnp.float32) * 0.05
    b1 = jax.random.normal(k2, (d_hid,), dtype=jnp.float32) * 0.01
    w2 = jax.random.normal(k3, (d_hid, d_in), dtype=jnp.float32) * 0.05
    b2 = jax.random.normal(k4, (d_in,), dtype=jnp.float32) * 0.01
    gamma = jnp.ones((d_in,), dtype=jnp.float32)
    beta = jnp.zeros((d_in,), dtype=jnp.float32)

    out = positionwise_ffn4(x, gamma, beta, w1, b1, w2, b2)
    out = jax.block_until_ready(out)

    # Pure-JAX f32 reference (eval-mode dropout = identity).
    def ref(xx):
        mean = jnp.mean(xx, axis=-1, keepdims=True)
        var = jnp.mean((xx - mean) ** 2, axis=-1, keepdims=True)
        xn = (xx - mean) / jnp.sqrt(var + 1e-6) * gamma + beta
        h = jnp.maximum(xn @ w1 + b1, 0.0)
        return h @ w2 + b2 + xx

    expected = ref(x)
    assert out.shape == (B, S, d_in)
    # bf16 MXU operands with f32 accumulation: compare at bf16-level tolerance.
    assert jnp.allclose(out, expected, atol=2e-2, rtol=2e-2), float(
        jnp.max(jnp.abs(out - expected)))
    print("KERNEL_OK")
</pallas_src>

<mosaic_0001>
module attributes {stable_mosaic.version = 11 : i64} {
  func.func @ffn_kernel(%arg0: i32, %arg1: i32, %arg2: memref<8x128xf32, #tpu.memory_space<vmem>>, %arg3: memref<1x128xf32, #tpu.memory_space<vmem>>, %arg4: memref<1x128xf32, #tpu.memory_space<vmem>>, %arg5: memref<1x128xf32, #tpu.memory_space<vmem>>, %arg6: memref<128x128xbf16, #tpu.memory_space<vmem>>, %arg7: memref<1x128xf32, #tpu.memory_space<vmem>>, %arg8: memref<128x128xbf16, #tpu.memory_space<vmem>>, %arg9: memref<1x128xf32, #tpu.memory_space<vmem>>, %arg10: memref<8x128xf32, #tpu.memory_space<vmem>>, %arg11: memref<8x128xbf16, #tpu.memory_space<vmem>>, %arg12: memref<8x128xf32, #tpu.memory_space<vmem>>) attributes {dimension_semantics = [#tpu.dimension_semantics<parallel>, #tpu.dimension_semantics<arbitrary>], iteration_bounds = array<i64: 2, 1>, scalar_prefetch = 0 : i64, scratch_operands = 2 : i64, tpu.core_type = #tpu.core_type<tc>, window_params = [{transform_indices = @transform_0, window_bounds = array<i64: 8, 128>}, {pipeline_mode = #tpu.pipeline_mode<synchronous>, transform_indices = @transform_1, window_bounds = array<i64: 1, 128>}, {pipeline_mode = #tpu.pipeline_mode<synchronous>, transform_indices = @transform_2, window_bounds = array<i64: 1, 128>}, {pipeline_mode = #tpu.pipeline_mode<synchronous>, transform_indices = @transform_3, window_bounds = array<i64: 1, 128>}, {pipeline_mode = #tpu.pipeline_mode<synchronous>, transform_indices = @transform_4, window_bounds = array<i64: 128, 128>}, {pipeline_mode = #tpu.pipeline_mode<synchronous>, transform_indices = @transform_5, window_bounds = array<i64: 1, 128>}, {pipeline_mode = #tpu.pipeline_mode<synchronous>, transform_indices = @transform_6, window_bounds = array<i64: 128, 128>}, {pipeline_mode = #tpu.pipeline_mode<synchronous>, transform_indices = @transform_7, window_bounds = array<i64: 1, 128>}, {transform_indices = @transform_8, window_bounds = array<i64: 8, 128>}]} {
    %c0_i32 = arith.constant 0 : i32
    %0 = arith.cmpi eq, %arg1, %c0_i32 : i32
    %1 = arith.extui %0 : i1 to i32
    %c0_i32_0 = arith.constant 0 : i32
    %2 = arith.cmpi ne, %1, %c0_i32_0 : i32
    scf.if %2 {
      %c0_16 = arith.constant 0 : index
      %c0_17 = arith.constant 0 : index
      %20 = vector.load %arg2[%c0_16, %c0_17] : memref<8x128xf32, #tpu.memory_space<vmem>>, vector<8x128xf32>
      %cst_18 = arith.constant dense<0.000000e+00> : vector<8xf32>
      %21 = vector.multi_reduction <add>, %20, %cst_18 [1] : vector<8x128xf32> to vector<8xf32>
      %22 = vector.shape_cast %21 : vector<8xf32> to vector<8x1xf32>
      %cst_19 = arith.constant 3.125000e-02 : f32
      %23 = vector.broadcast %cst_19 : f32 to vector<8x1xf32>
      %24 = arith.mulf %22, %23 : vector<8x1xf32>
      %25 = vector.broadcast %24 : vector<8x1xf32> to vector<8x128xf32>
      %26 = arith.subf %20, %25 : vector<8x128xf32>
      %c0_20 = arith.constant 0 : index
      %c0_21 = arith.constant 0 : index
      %27 = vector.load %arg3[%c0_20, %c0_21] : memref<1x128xf32, #tpu.memory_space<vmem>>, vector<1x128xf32>
      %28 = vector.broadcast %27 : vector<1x128xf32> to vector<8x128xf32>
      %29 = arith.mulf %26, %28 : vector<8x128xf32>
      %30 = arith.mulf %29, %29 : vector<8x128xf32>
      %cst_22 = arith.constant dense<0.000000e+00> : vector<8xf32>
      %31 = vector.multi_reduction <add>, %30, %cst_22 [1] : vector<8x128xf32> to vector<8xf32>
      %32 = vector.shape_cast %31 : vector<8xf32> to vector<8x1xf32>
      %cst_23 = arith.constant 3.125000e-02 : f32
      %33 = vector.broadcast %cst_23 : f32 to vector<8x1xf32>
      %34 = arith.mulf %32, %33 : vector<8x1xf32>
      %cst_24 = arith.constant 9.99999997E-7 : f32
      %35 = vector.broadcast %cst_24 : f32 to vector<8x1xf32>
      %36 = arith.addf %34, %35 : vector<8x1xf32>
      %37 = math.rsqrt %36 : vector<8x1xf32>
      %38 = vector.broadcast %37 : vector<8x1xf32> to vector<8x128xf32>
      %39 = arith.mulf %29, %38 : vector<8x128xf32>
      %c0_25 = arith.constant 0 : index
      %c0_26 = arith.constant 0 : index
      %40 = vector.load %arg4[%c0_25, %c0_26] : memref<1x128xf32, #tpu.memory_space<vmem>>, vector<1x128xf32>
      %41 = vector.broadcast %40 : vector<1x128xf32> to vector<8x128xf32>
      %42 = arith.mulf %39, %41 : vector<8x128xf32>
      %c0_27 = arith.constant 0 : index
      %c0_28 = arith.constant 0 : index
      %43 = vector.load %arg5[%c0_27, %c0_28] : memref<1x128xf32, #tpu.memory_space<vmem>>, vector<1x128xf32>
      %44 = vector.broadcast %43 : vector<1x128xf32> to vector<8x128xf32>
      %45 = arith.addf %42, %44 : vector<8x128xf32>
      %46 = arith.truncf %45 : vector<8x128xf32> to vector<8x128xbf16>
      %c0_29 = arith.constant 0 : index
      %c0_30 = arith.constant 0 : index
      %47 = vector.load %arg11[%c0_29, %c0_30] : memref<8x128xbf16, #tpu.memory_space<vmem>>, vector<8x128xbf16>
      tpu.vector_store %arg11[%c0_29, %c0_30], %46 {strides = array<i32>} : memref<8x128xbf16, #tpu.memory_space<vmem>>, vector<8x128xbf16>,
      %cst_31 = arith.constant 0.000000e+00 : f32
      %48 = vector.broadcast %cst_31 : f32 to vector<8x128xf32>
      %c0_32 = arith.constant 0 : index
      %c0_33 = arith.constant 0 : index
      %49 = vector.load %arg12[%c0_32, %c0_33] : memref<8x128xf32, #tpu.memory_space<vmem>>, vector<8x128xf32>
      tpu.vector_store %arg12[%c0_32, %c0_33], %48 {strides = array<i32>} : memref<8x128xf32, #tpu.memory_space<vmem>>, vector<8x128xf32>,
    } else {
    }
    %c0 = arith.constant 0 : index
    %c0_1 = arith.constant 0 : index
    %3 = vector.load %arg11[%c0, %c0_1] : memref<8x128xbf16, #tpu.memory_space<vmem>>, vector<8x128xbf16>
    %c0_2 = arith.constant 0 : index
    %c0_3 = arith.constant 0 : index
    %4 = vector.load %arg6[%c0_2, %c0_3] : memref<128x128xbf16, #tpu.memory_space<vmem>>, vector<128x128xbf16>
    %cst = arith.constant dense<0.000000e+00> : vector<8x128xf32>
    %5 = tpu.matmul %3, %4, %cst {dimension_numbers = #tpu.dot_dimension_numbers<[1], [0], [0], [1], [0, 0, 1, 1], [], []>} : vector<8x128xbf16>, vector<128x128xbf16>, vector<8x128xf32> -> vector<8x128xf32>
    %c0_4 = arith.constant 0 : index
    %c0_5 = arith.constant 0 : index
    %6 = vector.load %arg7[%c0_4, %c0_5] : memref<1x128xf32, #tpu.memory_space<vmem>>, vector<1x128xf32>
    %7 = vector.broadcast %6 : vector<1x128xf32> to vector<8x128xf32>
    %8 = arith.addf %5, %7 : vector<8x128xf32>
    %cst_6 = arith.constant 0.000000e+00 : f32
    %9 = vector.broadcast %cst_6 : f32 to vector<8x128xf32>
    %10 = arith.maximumf %8, %9 : vector<8x128xf32>
    %c0_7 = arith.constant 0 : index
    %c0_8 = arith.constant 0 : index
    %11 = vector.load %arg12[%c0_7, %c0_8] : memref<8x128xf32, #tpu.memory_space<vmem>>, vector<8x128xf32>
    %12 = arith.truncf %10 : vector<8x128xf32> to vector<8x128xbf16>
    %c0_9 = arith.constant 0 : index
    %c0_10 = arith.constant 0 : index
    %13 = vector.load %arg8[%c0_9, %c0_10] : memref<128x128xbf16, #tpu.memory_space<vmem>>, vector<128x128xbf16>
    %cst_11 = arith.constant dense<0.000000e+00> : vector<8x128xf32>
    %14 = tpu.matmul %12, %13, %cst_11 {dimension_numbers = #tpu.dot_dimension_numbers<[1], [0], [0], [1], [0, 0, 1, 1], [], []>} : vector<8x128xbf16>, vector<128x128xbf16>, vector<8x128xf32> -> vector<8x128xf32>
    %15 = arith.addf %11, %14 : vector<8x128xf32>
    %c0_12 = arith.constant 0 : index
    %c0_13 = arith.constant 0 : index
    %16 = vector.load %arg12[%c0_12, %c0_13] : memref<8x128xf32, #tpu.memory_space<vmem>>, vector<8x128xf32>
    tpu.vector_store %arg12[%c0_12, %c0_13], %15 {strides = array<i32>} : memref<8x128xf32, #tpu.memory_space<vmem>>, vector<8x128xf32>,
    %c0_i32_14 = arith.constant 0 : i32
    %17 = arith.cmpi eq, %arg1, %c0_i32_14 : i32
    %18 = arith.extui %17 : i1 to i32
    %c0_i32_15 = arith.constant 0 : i32
    %19 = arith.cmpi ne, %18, %c0_i32_15 : i32
    scf.if %19 {
      %c0_16 = arith.constant 0 : index
      %c0_17 = arith.constant 0 : index
      %20 = vector.load %arg12[%c0_16, %c0_17] : memref<8x128xf32, #tpu.memory_space<vmem>>, vector<8x128xf32>
      %c0_18 = arith.constant 0 : index
      %c0_19 = arith.constant 0 : index
      %21 = vector.load %arg9[%c0_18, %c0_19] : memref<1x128xf32, #tpu.memory_space<vmem>>, vector<1x128xf32>
      %22 = vector.broadcast %21 : vector<1x128xf32> to vector<8x128xf32>
      %23 = arith.addf %20, %22 : vector<8x128xf32>
      %c0_20 = arith.constant 0 : index
      %c0_21 = arith.constant 0 : index
      %24 = vector.load %arg2[%c0_20, %c0_21] : memref<8x128xf32, #tpu.memory_space<vmem>>, vector<8x128xf32>
      %25 = arith.addf %23, %24 : vector<8x128xf32>
      %c0_22 = arith.constant 0 : index
      %c0_23 = arith.constant 0 : index
      %26 = vector.load %arg10[%c0_22, %c0_23] : memref<8x128xf32, #tpu.memory_space<vmem>>, vector<8x128xf32>
      tpu.vector_store %arg10[%c0_22, %c0_23], %25 {strides = array<i32>} : memref<8x128xf32, #tpu.memory_space<vmem>>, vector<8x128xf32>,
    } else {
    }
    return
  }
  func.func @transform_0(%arg0: i32, %arg1: i32) -> (i32, i32) {
    %c0_i32 = arith.constant 0 : i32
    %c0_i32_0 = arith.constant 0 : i32
    return %arg0, %c0_i32 : i32, i32
  }
  func.func @transform_1(%arg0: i32, %arg1: i32) -> (i32, i32) {
    %c0_i32 = arith.constant 0 : i32
    %c0_i32_0 = arith.constant 0 : i32
    %c0_i32_1 = arith.constant 0 : i32
    return %c0_i32, %c0_i32_0 : i32, i32
  }
  func.func @transform_2(%arg0: i32, %arg1: i32) -> (i32, i32) {
    %c0_i32 = arith.constant 0 : i32
    %c0_i32_0 = arith.constant 0 : i32
    %c0_i32_1 = arith.constant 0 : i32
    return %c0_i32, %c0_i32_0 : i32, i32
  }
  func.func @transform_3(%arg0: i32, %arg1: i32) -> (i32, i32) {
    %c0_i32 = arith.constant 0 : i32
    %c0_i32_0 = arith.constant 0 : i32
    %c0_i32_1 = arith.constant 0 : i32
    return %c0_i32, %c0_i32_0 : i32, i32
  }
  func.func @transform_4(%arg0: i32, %arg1: i32) -> (i32, i32) {
    %c0_i32 = arith.constant 0 : i32
    %c0_i32_0 = arith.constant 0 : i32
    return %c0_i32, %arg1 : i32, i32
  }
  func.func @transform_5(%arg0: i32, %arg1: i32) -> (i32, i32) {
    %c0_i32 = arith.constant 0 : i32
    %c0_i32_0 = arith.constant 0 : i32
    return %c0_i32, %arg1 : i32, i32
  }
  func.func @transform_6(%arg0: i32, %arg1: i32) -> (i32, i32) {
    %c0_i32 = arith.constant 0 : i32
    %c0_i32_0 = arith.constant 0 : i32
    return %arg1, %c0_i32 : i32, i32
  }
  func.func @transform_7(%arg0: i32, %arg1: i32) -> (i32, i32) {
    %c0_i32 = arith.constant 0 : i32
    %c0_i32_0 = arith.constant 0 : i32
    %c0_i32_1 = arith.constant 0 : i32
    return %c0_i32, %c0_i32_0 : i32, i32
  }
  func.func @transform_8(%arg0: i32, %arg1: i32) -> (i32, i32) {
    %c0_i32 = arith.constant 0 : i32
    %c0_i32_0 = arith.constant 0 : i32
    return %arg0, %c0_i32 : i32, i32
  }
}

module attributes {stable_mosaic.version = 11 : i64} {
  func.func @ffn_kernel(%arg0: i32, %arg1: i32, %arg2: memref<8x128xf32, #tpu.memory_space<vmem>>, %arg3: memref<1x128xf32, #tpu.memory_space<vmem>>, %arg4: memref<1x128xf32, #tpu.memory_space<vmem>>, %arg5: memref<1x128xf32, #tpu.memory_space<vmem>>, %arg6: memref<128x128xbf16, #tpu.memory_space<vmem>>, %arg7: memref<1x128xf32, #tpu.memory_space<vmem>>, %arg8: memref<128x128xbf16, #tpu.memory_space<vmem>>, %arg9: memref<1x128xf32, #tpu.memory_space<vmem>>, %arg10: memref<8x128xf32, #tpu.memory_space<vmem>>, %arg11: memref<8x128xbf16, #tpu.memory_space<vmem>>, %arg12: memref<8x128xf32, #tpu.memory_space<vmem>>) attributes {dimension_semantics = [#tpu.dimension_semantics<parallel>, #tpu.dimension_semantics<arbitrary>], iteration_bounds = array<i64: 2, 1>, scalar_prefetch = 0 : i64, scratch_operands = 2 : i64, tpu.core_type = #tpu.core_type<tc>, window_params = [{transform_indices = @transform_0, window_bounds = array<i64: 8, 128>}, {pipeline_mode = #tpu.pipeline_mode<synchronous>, transform_indices = @transform_1, window_bounds = array<i64: 1, 128>}, {pipeline_mode = #tpu.pipeline_mode<synchronous>, transform_indices = @transform_2, window_bounds = array<i64: 1, 128>}, {pipeline_mode = #tpu.pipeline_mode<synchronous>, transform_indices = @transform_3, window_bounds = array<i64: 1, 128>}, {transform_indices = @transform_4, window_bounds = array<i64: 128, 128>}, {transform_indices = @transform_5, window_bounds = array<i64: 1, 128>}, {transform_indices = @transform_6, window_bounds = array<i64: 128, 128>}, {pipeline_mode = #tpu.pipeline_mode<synchronous>, transform_indices = @transform_7, window_bounds = array<i64: 1, 128>}, {transform_indices = @transform_8, window_bounds = array<i64: 8, 128>}]} {
    %c0_i32 = arith.constant 0 : i32
    %0 = arith.cmpi eq, %arg1, %c0_i32 : i32
    %1 = arith.extui %0 : i1 to i32
    %c0_i32_0 = arith.constant 0 : i32
    %2 = arith.cmpi ne, %1, %c0_i32_0 : i32
    scf.if %2 {
      %c0_16 = arith.constant 0 : index
      %c0_17 = arith.constant 0 : index
      %20 = vector.load %arg2[%c0_16, %c0_17] : memref<8x128xf32, #tpu.memory_space<vmem>>, vector<8x128xf32>
      %cst_18 = arith.constant dense<0.000000e+00> : vector<8xf32>
      %21 = vector.multi_reduction <add>, %20, %cst_18 [1] : vector<8x128xf32> to vector<8xf32>
      %22 = vector.shape_cast %21 : vector<8xf32> to vector<8x1xf32>
      %cst_19 = arith.constant 3.125000e-02 : f32
      %23 = vector.broadcast %cst_19 : f32 to vector<8x1xf32>
      %24 = arith.mulf %22, %23 : vector<8x1xf32>
      %25 = vector.broadcast %24 : vector<8x1xf32> to vector<8x128xf32>
      %26 = arith.subf %20, %25 : vector<8x128xf32>
      %c0_20 = arith.constant 0 : index
      %c0_21 = arith.constant 0 : index
      %27 = vector.load %arg3[%c0_20, %c0_21] : memref<1x128xf32, #tpu.memory_space<vmem>>, vector<1x128xf32>
      %28 = vector.broadcast %27 : vector<1x128xf32> to vector<8x128xf32>
      %29 = arith.mulf %26, %28 : vector<8x128xf32>
      %30 = arith.mulf %29, %29 : vector<8x128xf32>
      %cst_22 = arith.constant dense<0.000000e+00> : vector<8xf32>
      %31 = vector.multi_reduction <add>, %30, %cst_22 [1] : vector<8x128xf32> to vector<8xf32>
      %32 = vector.shape_cast %31 : vector<8xf32> to vector<8x1xf32>
      %cst_23 = arith.constant 3.125000e-02 : f32
      %33 = vector.broadcast %cst_23 : f32 to vector<8x1xf32>
      %34 = arith.mulf %32, %33 : vector<8x1xf32>
      %cst_24 = arith.constant 9.99999997E-7 : f32
      %35 = vector.broadcast %cst_24 : f32 to vector<8x1xf32>
      %36 = arith.addf %34, %35 : vector<8x1xf32>
      %37 = math.rsqrt %36 : vector<8x1xf32>
      %38 = vector.broadcast %37 : vector<8x1xf32> to vector<8x128xf32>
      %39 = arith.mulf %29, %38 : vector<8x128xf32>
      %c0_25 = arith.constant 0 : index
      %c0_26 = arith.constant 0 : index
      %40 = vector.load %arg4[%c0_25, %c0_26] : memref<1x128xf32, #tpu.memory_space<vmem>>, vector<1x128xf32>
      %41 = vector.broadcast %40 : vector<1x128xf32> to vector<8x128xf32>
      %42 = arith.mulf %39, %41 : vector<8x128xf32>
      %c0_27 = arith.constant 0 : index
      %c0_28 = arith.constant 0 : index
      %43 = vector.load %arg5[%c0_27, %c0_28] : memref<1x128xf32, #tpu.memory_space<vmem>>, vector<1x128xf32>
      %44 = vector.broadcast %43 : vector<1x128xf32> to vector<8x128xf32>
      %45 = arith.addf %42, %44 : vector<8x128xf32>
      %46 = arith.truncf %45 : vector<8x128xf32> to vector<8x128xbf16>
      %c0_29 = arith.constant 0 : index
      %c0_30 = arith.constant 0 : index
      %47 = vector.load %arg11[%c0_29, %c0_30] : memref<8x128xbf16, #tpu.memory_space<vmem>>, vector<8x128xbf16>
      tpu.vector_store %arg11[%c0_29, %c0_30], %46 {strides = array<i32>} : memref<8x128xbf16, #tpu.memory_space<vmem>>, vector<8x128xbf16>,
      %cst_31 = arith.constant 0.000000e+00 : f32
      %48 = vector.broadcast %cst_31 : f32 to vector<8x128xf32>
      %c0_32 = arith.constant 0 : index
      %c0_33 = arith.constant 0 : index
      %49 = vector.load %arg12[%c0_32, %c0_33] : memref<8x128xf32, #tpu.memory_space<vmem>>, vector<8x128xf32>
      tpu.vector_store %arg12[%c0_32, %c0_33], %48 {strides = array<i32>} : memref<8x128xf32, #tpu.memory_space<vmem>>, vector<8x128xf32>,
    } else {
    }
    %c0 = arith.constant 0 : index
    %c0_1 = arith.constant 0 : index
    %3 = vector.load %arg11[%c0, %c0_1] : memref<8x128xbf16, #tpu.memory_space<vmem>>, vector<8x128xbf16>
    %c0_2 = arith.constant 0 : index
    %c0_3 = arith.constant 0 : index
    %4 = vector.load %arg6[%c0_2, %c0_3] : memref<128x128xbf16, #tpu.memory_space<vmem>>, vector<128x128xbf16>
    %cst = arith.constant dense<0.000000e+00> : vector<8x128xf32>
    %5 = tpu.matmul %3, %4, %cst {dimension_numbers = #tpu.dot_dimension_numbers<[1], [0], [0], [1], [0, 0, 1, 1], [], []>} : vector<8x128xbf16>, vector<128x128xbf16>, vector<8x128xf32> -> vector<8x128xf32>
    %c0_4 = arith.constant 0 : index
    %c0_5 = arith.constant 0 : index
    %6 = vector.load %arg7[%c0_4, %c0_5] : memref<1x128xf32, #tpu.memory_space<vmem>>, vector<1x128xf32>
    %7 = vector.broadcast %6 : vector<1x128xf32> to vector<8x128xf32>
    %8 = arith.addf %5, %7 : vector<8x128xf32>
    %cst_6 = arith.constant 0.000000e+00 : f32
    %9 = vector.broadcast %cst_6 : f32 to vector<8x128xf32>
    %10 = arith.maximumf %8, %9 : vector<8x128xf32>
    %c0_7 = arith.constant 0 : index
    %c0_8 = arith.constant 0 : index
    %11 = vector.load %arg12[%c0_7, %c0_8] : memref<8x128xf32, #tpu.memory_space<vmem>>, vector<8x128xf32>
    %12 = arith.truncf %10 : vector<8x128xf32> to vector<8x128xbf16>
    %c0_9 = arith.constant 0 : index
    %c0_10 = arith.constant 0 : index
    %13 = vector.load %arg8[%c0_9, %c0_10] : memref<128x128xbf16, #tpu.memory_space<vmem>>, vector<128x128xbf16>
    %cst_11 = arith.constant dense<0.000000e+00> : vector<8x128xf32>
    %14 = tpu.matmul %12, %13, %cst_11 {dimension_numbers = #tpu.dot_dimension_numbers<[1], [0], [0], [1], [0, 0, 1, 1], [], []>} : vector<8x128xbf16>, vector<128x128xbf16>, vector<8x128xf32> -> vector<8x128xf32>
    %15 = arith.addf %11, %14 : vector<8x128xf32>
    %c0_12 = arith.constant 0 : index
    %c0_13 = arith.constant 0 : index
    %16 = vector.load %arg12[%c0_12, %c0_13] : memref<8x128xf32, #tpu.memory_space<vmem>>, vector<8x128xf32>
    tpu.vector_store %arg12[%c0_12, %c0_13], %15 {strides = array<i32>} : memref<8x128xf32, #tpu.memory_space<vmem>>, vector<8x128xf32>,
    %c0_i32_14 = arith.constant 0 : i32
    %17 = arith.cmpi eq, %arg1, %c0_i32_14 : i32
    %18 = arith.extui %17 : i1 to i32
    %c0_i32_15 = arith.constant 0 : i32
    %19 = arith.cmpi ne, %18, %c0_i32_15 : i32
    scf.if %19 {
      %c0_16 = arith.constant 0 : index
      %c0_17 = arith.constant 0 : index
      %20 = vector.load %arg12[%c0_16, %c0_17] : memref<8x128xf32, #tpu.memory_space<vmem>>, vector<8x128xf32>
      %c0_18 = arith.constant 0 : index
      %c0_19 = arith.constant 0 : index
      %21 = vector.load %arg9[%c0_18, %c0_19] : memref<1x128xf32, #tpu.memory_space<vmem>>, vector<1x128xf32>
      %22 = vector.broadcast %21 : vector<1x128xf32> to vector<8x128xf32>
      %23 = arith.addf %20, %22 : vector<8x128xf32>
      %c0_20 = arith.constant 0 : index
      %c0_21 = arith.constant 0 : index
      %24 = vector.load %arg2[%c0_20, %c0_21] : memref<8x128xf32, #tpu.memory_space<vmem>>, vector<8x128xf32>
      %25 = arith.addf %23, %24 : vector<8x128xf32>
      %c0_22 = arith.constant 0 : index
      %c0_23 = arith.constant 0 : index
      %26 = vector.load %arg10[%c0_22, %c0_23] : memref<8x128xf32, #tpu.memory_space<vmem>>, vector<8x128xf32>
      tpu.vector_store %arg10[%c0_22, %c0_23], %25 {strides = array<i32>} : memref<8x128xf32, #tpu.memory_space<vmem>>, vector<8x128xf32>,
    } else {
    }
    return
  }
  func.func @transform_0(%arg0: i32, %arg1: i32) -> (i32, i32) {
    %c0_i32 = arith.constant 0 : i32
    %c0_i32_0 = arith.constant 0 : i32
    return %arg0, %c0_i32 : i32, i32
  }
  func.func @transform_1(%arg0: i32, %arg1: i32) -> (i32, i32) {
    %c0_i32 = arith.constant 0 : i32
    %c0_i32_0 = arith.constant 0 : i32
    %c0_i32_1 = arith.constant 0 : i32
    return %c0_i32, %c0_i32_0 : i32, i32
  }
  func.func @transform_2(%arg0: i32, %arg1: i32) -> (i32, i32) {
    %c0_i32 = arith.constant 0 : i32
    %c0_i32_0 = arith.constant 0 : i32
    %c0_i32_1 = arith.constant 0 : i32
    return %c0_i32, %c0_i32_0 : i32, i32
  }
  func.func @transform_3(%arg0: i32, %arg1: i32) -> (i32, i32) {
    %c0_i32 = arith.constant 0 : i32
    %c0_i32_0 = arith.constant 0 : i32
    %c0_i32_1 = arith.constant 0 : i32
    return %c0_i32, %c0_i32_0 : i32, i32
  }
  func.func @transform_4(%arg0: i32, %arg1: i32) -> (i32, i32) {
    %c0_i32 = arith.constant 0 : i32
    %c0_i32_0 = arith.constant 0 : i32
    return %c0_i32, %arg1 : i32, i32
  }
  func.func @transform_5(%arg0: i32, %arg1: i32) -> (i32, i32) {
    %c0_i32 = arith.constant 0 : i32
    %c0_i32_0 = arith.constant 0 : i32
    return %c0_i32, %arg1 : i32, i32
  }
  func.func @transform_6(%arg0: i32, %arg1: i32) -> (i32, i32) {
    %c0_i32 = arith.constant 0 : i32
    %c0_i32_0 = arith.constant 0 : i32
    return %arg1, %c0_i32 : i32, i32
  }
  func.func @transform_7(%arg0: i32, %arg1: i32) -> (i32, i32) {
    %c0_i32 = arith.constant 0 : i32
    %c0_i32_0 = arith.constant 0 : i32
    %c0_i32_1 = arith.constant 0 : i32
    return %c0_i32, %c0_i32_0 : i32, i32
  }
  func.func @transform_8(%arg0: i32, %arg1: i32) -> (i32, i32) {
    %c0_i32 = arith.constant 0 : i32
    %c0_i32_0 = arith.constant 0 : i32
    return %arg0, %c0_i32 : i32, i32
  }
}

</mosaic_0001>

<bundles_post_ra>
// kernel: tpu_custom_call.1
= control target key start
LH: loop header
LB: loop body
LE: loop exit
PB: predicated region body
PF: predicated region fallthrough
CT: control target
= control target key end

     0   :  { %s1520_s0 = inlined_call_operand.hbm [shape: f32[16,128], index: 0, kind: input, shape index: {}]   ;;  %s1521_s1 = inlined_call_operand.vmem [shape: f32[1,128], index: 1, kind: input, shape index: {}]   ;;  %s1522_s2 = inlined_call_operand.vmem [shape: f32[1,128], index: 2, kind: input, shape index: {}]   ;;  %s1523_s3 = inlined_call_operand.vmem [shape: f32[1,128], index: 3, kind: input, shape index: {}]   ;;  %s1524_s4 = inlined_call_operand.hbm [shape: bf16[128,128], index: 4, kind: input, shape index: {}]   ;;  %s1525_s5 = inlined_call_operand.vmem [shape: f32[1,128], index: 5, kind: input, shape index: {}]   ;;  %s1526_s6 = inlined_call_operand.hbm [shape: bf16[128,128], index: 6, kind: input, shape index: {}]   ;;  %s1527_s7 = inlined_call_operand.vmem [shape: f32[1,128], index: 7, kind: input, shape index: {}]   ;;  %s1528_s8 = inlined_call_operand.hbm [shape: f32[16,128], index: 8, kind: output, shape index: {}]  }
   0x1   :  { %1536 = sst [smem:[#allocation16_spill]] %s1528_s8 }
   0x2   :  { %13 = vsyncpa [#allocation5], 0 }
   0x3   :  { %15 = vsyncpa [#allocation5 + $0x1], 0 }
   0x4   :  { %16 = vsyncpa [#allocation8], 0 }
   0x5   :  { %17 = vsyncpa [#allocation6], 0 }
   0x6   :  { %19 = vsyncpa [#allocation6 + $0x1], 0  ;;  %s1228_s27 = smov 0   ;;  %s1230_s28 = smov 0  }
   0x7   :  { %s1232_s29 = smov 0   ;;  %s1234_s30 = smov 0  }
   0x8   :  { %s1236_s9 = smov 0   ;;  %s1238_s10 = smov 0  }
   0x9 LB: > { %1537 = sst [smem:[#allocation14_spill]] %s1153_s27  ;;  %s799_s11 = sadd.s32 4294967295, %s1173_s10   ;;  %s1173_s10 = sphi %s1238_s10, %s25_s10   ;;  %s1169_s9 = sphi %s1236_s9, %s1559_s9   ;;  %s1165_s30 = sphi %s1234_s30, %s1558_s30   ;;  %s1161_s29 = sphi %s1232_s29, %s1557_s29   ;;  %s1157_s28 = sphi %s1230_s28, %s1556_s28   ;;  %s1153_s27 = sphi %s1228_s27, %s1555_s27  }
   0xa   : > { %s800_s12 = sadd.s32 4294967294, %s1173_s10   ;;  %p57_p0 = scmp.ne.s32.totalorder %s1157_s28, %s1153_s27 }
   0xb   : > { %p1262_p1 = scmp.eq.s32.totalorder %s799_s11, 0  ;;  %p1266_p2 = scmp.eq.s32.totalorder %s799_s11, 1 }
   0xc   : > { %p249_p3 = scmp.eq.s32.totalorder %s800_s12, 1  ;;  %p801_p5 = scmp.ge.s32.totalorder %s1173_s10, 1 }
   0xd   : > { %s1538_s13 = scalar_select %p1262_p1, 1, 0 }
   0xe   : > { %p1272_p4 = por %p1262_p1, %p57_p0  ;;  %p1277_p6 = por %p249_p3, %p57_p0 }
   0xf   : > { %p256_p7 = scmp.lt.s32.totalorder %s1173_s10, 3  ;;  %s1175_s18 = smov [#allocation7]  }
  0x10   : > { %s1540_s15 = scalar_select %p1272_p4, 1, 0 }
  0x11   : > { %s1541_s16 = scalar_select %p1277_p6, 1, 0 }
  0x12   : > { %p1282_p8 = pnand %p801_p5, %p256_p7  ;;  %s279_s19 = sshll.u32 %s1175_s18, 4  ;;  %s1286_s19 = int_to_ptr.vmem [resolvable:$true] %s279_s19 }
  0x13   : > { %1542 = sst [smem:[#allocation15_spill]] %s1541_s16  ;;  %s1176_s21 = smov [#allocation9]  }
  0x14   : > { %p908_p9 = pneg %p1282_p8  ;;  %s301_s22 = sshll.u32 %s1176_s21, 4  ;;  %s1297_s22 = int_to_ptr.vmem [resolvable:$true] %s301_s22 }
  0x15   : > { %s1001_s25 = scalar_lea.hbm %s1524_s4, 1024 }
  0x16   : > { %p1293_p11 = pnand %p908_p9, %p1262_p1  ;;  %p1002_p12 = scmp.ne.s32.totalorder %s1524_s4, %s1001_s25 }
  0x17   : > { %p1008_p5 = scmp.lt.u32.totalorder %s1001_s25, %s1524_s4 }
  0x18   : > { %p1003_p13 = pneg %p1293_p11 }
  0x1a   : > { %p1004_p0 = pnand %p1003_p13, %p1002_p12 }
  0x1c   : > { %p1005_p3 = pneg %p1004_p0 }
  0x1e   : > { %p1010_p7 = pnand %p1008_p5, %p1005_p3 }
  0x20   : > { %1013 = shalt.err (!%p1010_p7)
}
  0x21   : > { %s1014_s21 = scalar_lea.vmem %s1286_s19, 1024  ;;  %p1022_p1 = scmp.lt.s32.totalorder %s1286_s19, %s1286_s19 }
  0x22   : > { %p1015_p9 = scmp.ne.s32.totalorder %s1286_s19, %s1014_s21  ;;  %p1023_p12 = scmp.lt.s32.totalorder %s1014_s21, %s1014_s21 }
  0x24   : > { %p1017_p10 = pnand %p1015_p9, %p1003_p13  ;;  %p1024_p0 = por %p1023_p12, %p1022_p1 }
  0x26   : > { %p1018_p6 = pneg %p1017_p10 }
  0x28   : > { %p1025_p4 = pnand %p1024_p0, %p1018_p6 }
  0x2a   : > { %1028 = shalt.err (!%p1025_p4)
}
  0x2b   : > { %s1177_s23 = smov 64   ;;  %s1178_s24 = smov 4  }
  0x2c   : > { %911 = dma.hbm_to_vmem [thread:$0]  (!%p1293_p11), %s1524_s4, 1024, %s1286_s19, [#allocation8], %s1177_s23, %s1177_s23, %s1178_s24  }
  0x2d   : > { %s1029_s18 = scalar_lea.hbm %s1526_s6, 1024 }
  0x2e   : > { %p1030_p1 = scmp.ne.s32.totalorder %s1526_s6, %s1029_s18  ;;  %p1036_p10 = scmp.lt.u32.totalorder %s1029_s18, %s1526_s6 }
  0x30   : > { %p1032_p4 = pnand %p1030_p1, %p1003_p13 }
  0x32   : > { %p1033_p6 = pneg %p1032_p4 }
  0x34   : > { %p1038_p3 = pnand %p1036_p10, %p1033_p6 }
  0x36   : > { %1041 = shalt.err (!%p1038_p3)
}
  0x37   : > { %s1042_s19 = scalar_lea.vmem %s1297_s22, 1024  ;;  %p1050_p12 = scmp.lt.s32.totalorder %s1297_s22, %s1297_s22 }
  0x38   : > { %p1043_p5 = scmp.ne.s32.totalorder %s1297_s22, %s1042_s19  ;;  %p1051_p0 = scmp.lt.s32.totalorder %s1042_s19, %s1042_s19 }
  0x3a   : > { %p1045_p7 = pnand %p1043_p5, %p1003_p13  ;;  %p1052_p1 = por %p1051_p0, %p1050_p12 }
  0x3c   : > { %p1046_p9 = pneg %p1045_p7 }
  0x3e   : > { %p1053_p4 = pnand %p1052_p1, %p1046_p9 }
  0x40   : > { %1056 = shalt.err (!%p1053_p4)
}
  0x41   : > { %914 = dma.hbm_to_vmem [thread:$0]  (!%p1293_p11), %s1526_s6, 1024, %s1297_s22, [#allocation8], %s1177_s23, %s1177_s23, %s1178_s24  }
  0x42   : > { %s37_s16 = sadd.s32 1, %s1169_s9  ;;  %s44_s25 = sadd.s32 1, %s1161_s29 }
  0x43   : > { %p39_p13 = scmp.ge.s32.totalorder %s37_s16, 2  ;;  %p51_p6 = scmp.ne.s32.totalorder %s1161_s29, %s1157_s28 }
  0x44   : > { %p52_p10 = scmp.eq.s32.totalorder %s1173_s10, 0  ;;  %p925_p3 = scmp.lt.s32.totalorder %s1173_s10, 2 }
  0x45   : > { %s1561_s16 = smov (%p39_p13, %s37_s16), 0  ;;  %p1361_p7 = por %p1266_p2, %p51_p6 }
  0x46   : > { %p53_p5 = por %p52_p10, %p51_p6  ;;  %s41_s26 = ssub.s32 %s1169_s9, %s1561_s16 }
  0x47   : > { %s1545_s20 = scalar_select %p1361_p7, 1, 0 }
  0x48   : > { %s318_s11 = sand.u32 1, %s1161_s29   ;;  %p42_p9 = scmp.eq.s32.totalorder %s41_s26, 0 }
  0x49   : > { %s806_s22 = sshll.u32 %s318_s11, 3  ;;  %s807_s23 = sshll.u32 %s1169_s9, 7 }
  0x4a   : > { %s1370_s24 = scalar_select %p42_p9, %s1161_s29, %s44_s25  }
  0x4b   : > { %s1375_s21 = scalar_lea.hbm %s1520_s0, %s807_s23  ;;  %s322_s14 = scalar_lea.vmem [#allocation4], %s806_s22 }
  0x4c   : > { %s329_s19 = sshll.u32 %s322_s14, 4  ;;  %p1379_p2 = pnand %p925_p3, %p53_p5  ;;  %s1383_s19 = int_to_ptr.vmem [resolvable:$true] %s329_s19 }
  0x4d   : > { %s319_s27 = scalar_lea.sflag [#allocation5], %s318_s11  ;;  %s1057_s25 = scalar_lea.hbm %s1375_s21, 128 }
  0x4e   : > { %p1058_p11 = scmp.ne.s32.totalorder %s1375_s21, %s1057_s25  ;;  %p1059_p12 = pneg %p1379_p2 }
  0x4f   : > { %s1062_s23 = scalar_lea.hbm %s1520_s0, 256  ;;  %p1063_p4 = scmp.lt.u32.totalorder %s1375_s21, %s1520_s0 }
  0x50   : > { %p1060_p0 = pnand %p1059_p12, %p1058_p11  ;;  %p1064_p13 = scmp.lt.u32.totalorder %s1062_s23, %s1057_s25 }
  0x51   : > { %p1066_p10 = scmp.lt.u32.totalorder %s1057_s25, %s1375_s21 }
  0x52   : > { %p1061_p1 = pneg %p1060_p0  ;;  %p1065_p6 = por %p1064_p13, %p1063_p4 }
  0x54   : > { %p1067_p3 = por %p1066_p10, %p1065_p6 }
  0x56   : > { %p1068_p5 = pnand %p1067_p3, %p1061_p1 }
  0x58   : > { %1071 = shalt.err (!%p1068_p5)
}
  0x59   : > { %s1072_s11 = scalar_lea.vmem %s1383_s19, 128  ;;  %s1179_s14 = smov [#allocation4]  }
  0x5a   : > { %p1073_p9 = scmp.ne.s32.totalorder %s1383_s19, %s1072_s11  ;;  %s1077_s26 = sshll.u32 %s1179_s14, 4  ;;  %s1078_s26 = int_to_ptr.vmem [resolvable:$false] %s1077_s26 }
  0x5b   : > { %s1079_s22 = scalar_lea.vmem %s1078_s26, 256  ;;  %p1080_p7 = scmp.lt.s32.totalorder %s1383_s19, %s1078_s26 }
  0x5c   : > { %p1075_p11 = pnand %p1073_p9, %p1059_p12  ;;  %p1081_p4 = scmp.lt.s32.totalorder %s1079_s22, %s1072_s11 }
  0x5e   : > { %p1076_p0 = pneg %p1075_p11  ;;  %p1082_p13 = por %p1081_p4, %p1080_p7 }
  0x60   : > { %p1083_p6 = pnand %p1082_p13, %p1076_p0 }
  0x62   : > { %1086 = shalt.err (!%p1083_p6)
}
  0x63   : > { %918 = dma.hbm_to_vmem [thread:$0]  (!%p1379_p2), %s1375_s21, 128, %s1383_s19, %s319_s27  }
  0x64   : > { %338 = sbr.rel (%p1282_p8) target bundleno = 883 (0x373), region = 52  ;;  %s1413_s25 = sand.u32 (!%p1282_p8), 1, %s1157_s28  }
  0x65   : > { %s809_s23 = sshll.u32 (!%p1282_p8), %s1413_s25, 3  ;;  %s341_s12 = scalar_lea.sflag (!%p1282_p8), [#allocation5], %s1413_s25 }
  0x66   : > { %s344_s18 = scalar_lea.vmem (!%p1282_p8), [#allocation4], %s809_s23  ;;  %p1547_p7 = scmp.ne.s32.totalorder (!%p1282_p8), %s1540_s15, 0 }
  0x6b   : > { %1140 = dma.done.wait (%p1547_p7), %s341_s12, 128  }
  0x6c   : > { %1142 = vsyncadd (%p1547_p7), %s341_s12, 4294967168  ;;  %p1548_p2 = scmp.ne.s32.totalorder %s1538_s13, 0 }
  0x6e   : > { %1144 = dma.done.wait (%p1548_p2), [#allocation8], 2048  }
  0x6f   : > { %1146 = vsyncadd (%p1548_p2), [#allocation8], 4294965248  ;;  %v1427_v0 = vld [vmem:[%s344_s18] sm:$0xff]  ;;  %v1180_v1 = vmov 0.0   ;;  %v813_v4 = vld [vmem:[%s1521_s1] ss:$0 sm:$0xff] }
  0x70   : > { %398 = vadd.xlane.f32.xlu0 %v1427_v0  ;;  %856 = vmatprep.subr.bf16.mxu0 %v1180_v1  ;;  %v983_v8 = vld [vmem:[#allocation7] sm:$0xff]   ;;  %v984_v9 = vld [vmem:[#allocation7 + $0x8] sm:$0xff]   ;;  %v985_v10 = vld [vmem:[#allocation7 + $0x10] sm:$0xff]   ;;  %vm1181_vm0 = vmmov 0   ;;  %s835_s22 = sshll.u32 %s1165_s30, 7  ;;  %s387_s12 = scalar_lea.vmem [#allocation10], %s809_s23 }
  0x71   : > { %876 = vmatprep.subr.bf16.mxu1 %v1180_v1  ;;  %857 = vmatpush3.bf16.msra.mxu0 %v983_v8  ;;  %v986_v11 = vld [vmem:[#allocation7 + $0x18] sm:$0xff]   ;;  %v987_v12 = vld [vmem:[#allocation7 + $0x20] sm:$0xff]   ;;  %v988_v13 = vld [vmem:[#allocation7 + $0x28] sm:$0xff]   ;;  %s686_s18 = sshll.u32 %s387_s12, 4  ;;  %s1549_s13 = sld [smem:[#allocation16_spill]]  ;;  %s1473_s18 = int_to_ptr.vmem [resolvable:$true] %s686_s18 }
  0x72   : > { %858 = vmatprep.subr.bf16.mxu0 %v1180_v1  ;;  %v989_v14 = vld [vmem:[#allocation7 + $0x30] sm:$0xff]   ;;  %v990_v15 = vld [vmem:[#allocation7 + $0x38] sm:$0xff]   ;;  %872 = vmatprep.mubr.msk.bf16.mxu0 %vm1181_vm0, %v1180_v1  ;;  %v991_v16 = vld [vmem:[#allocation9] sm:$0xff]   ;;  %s673_s30 = scalar_lea.sflag [#allocation6], %s1413_s25  ;;  %s1087_s23 = scalar_lea.vmem %s1473_s18, 128 }
  0x73   : > { %892 = vmatprep.mubr.msk.bf16.mxu1 %vm1181_vm0, %v1180_v1  ;;  %877 = vmatpush3.bf16.msra.mxu1 %v991_v16  ;;  %v992_v17 = vld [vmem:[#allocation9 + $0x8] sm:$0xff]   ;;  %v993_v18 = vld [vmem:[#allocation9 + $0x10] sm:$0xff]   ;;  %v994_v19 = vld [vmem:[#allocation9 + $0x18] sm:$0xff]   ;;  %p1088_p8 = scmp.ne.s32.totalorder %s1473_s18, %s1087_s23  ;;  %p1550_p12 = scmp.ne.s32.totalorder %s1545_s20, 0 }
  0x74   : > { %878 = vmatprep.subr.bf16.mxu1 %v1180_v1  ;;  %v995_v20 = vld [vmem:[#allocation9 + $0x20] sm:$0xff]   ;;  %v996_v21 = vld [vmem:[#allocation9 + $0x28] sm:$0xff]   ;;  %v997_v33 = vld [vmem:[#allocation9 + $0x30] sm:$0xff]   ;;  %s1182_s19 = smov [#allocation10]  }
  0x75   : > { %859 = vmatpush3.bf16.msra.mxu0 %v984_v9  ;;  %v814_v26 = vld [vmem:[%s1522_s2] ss:$0 sm:$0xff]  ;;  %v998_v34 = vld [vmem:[#allocation9 + $0x38] sm:$0xff]   ;;  %p1089_p1 = pnand %p1088_p8, %p1550_p12  ;;  %s1091_s8 = sshll.u32 %s1182_s19, 4  ;;  %s1092_s8 = int_to_ptr.vmem [resolvable:$false] %s1091_s8 }
  0x76   : > { %860 = vmatprep.subr.bf16.mxu0 %v1180_v1  ;;  %v815_v28 = vld [vmem:[%s1523_s3] ss:$0 sm:$0xff]  ;;  %s1093_s27 = scalar_lea.vmem %s1092_s8, 256  ;;  %p1094_p3 = scmp.lt.s32.totalorder %s1473_s18, %s1092_s8 }
  0x77   : > { %879 = vmatpush3.bf16.msra.mxu1 %v992_v17  ;;  %v816_v35 = vld [vmem:[%s1525_s5] ss:$0 sm:$0xff]  ;;  %s1471_s21 = scalar_lea.hbm %s1549_s13, %s835_s22  ;;  %p1090_p10 = pneg %p1089_p1 }
  0x78   : > { %880 = vmatprep.subr.bf16.mxu1 %v1180_v1  ;;  %v833_v43 = vld [vmem:[%s1527_s7] ss:$0 sm:$0xff]  ;;  %p1095_p5 = scmp.lt.s32.totalorder %s1093_s27, %s1087_s23 }
  0x79   : > { %861 = vmatpush3.bf16.msra.mxu0 %v985_v10 }
  0x7a   : > { %862 = vmatprep.subr.bf16.mxu0 %v1180_v1  ;;  %p1096_p9 = por %p1095_p5, %p1094_p3 }
  0x7b   : > { %881 = vmatpush3.bf16.msra.mxu1 %v993_v18 }
  0x7c   : > { %882 = vmatprep.subr.bf16.mxu1 %v1180_v1  ;;  %p1097_p11 = pnand %p1096_p9, %p1090_p10 }
  0x7d   : > { %863 = vmatpush3.bf16.msra.mxu0 %v986_v11 }
  0x7e   : > { %864 = vmatprep.subr.bf16.mxu0 %v1180_v1 }
  0x7f   : > { %883 = vmatpush3.bf16.msra.mxu1 %v994_v19 }
  0x80   : > { %884 = vmatprep.subr.bf16.mxu1 %v1180_v1 }
  0x81   : > { %865 = vmatpush3.bf16.msra.mxu0 %v987_v12 }
  0x82   : > { %866 = vmatprep.subr.bf16.mxu0 %v1180_v1 }
  0x83   : > { %885 = vmatpush3.bf16.msra.mxu1 %v995_v20 }
  0x84   : > { %886 = vmatprep.subr.bf16.mxu1 %v1180_v1 }
  0x85   : > { %867 = vmatpush3.bf16.msra.mxu0 %v988_v13 }
  0x86   : > { %868 = vmatprep.subr.bf16.mxu0 %v1180_v1 }
  0x87   : > { %887 = vmatpush3.bf16.msra.mxu1 %v996_v21 }
  0x88   : > { %888 = vmatprep.subr.bf16.mxu1 %v1180_v1 }
  0x89   : > { %869 = vmatpush3.bf16.msra.mxu0 %v989_v14 }
  0x8a   : > { %870 = vmatprep.subr.bf16.mxu0 %v1180_v1 }
  0x8b   : > { %889 = vmatpush3.bf16.msra.mxu1 %v997_v33 }
  0x8c   : > { %890 = vmatprep.subr.bf16.mxu1 %v1180_v1 }
  0x8d   : > { %871 = vmatpush3.bf16.msra.mxu0 %v990_v15 }
  0x8f   : > { %891 = vmatpush3.bf16.msra.mxu1 %v998_v34 }
  0xfd   : > { %v399_v2 = vpop.xlane.xlu0 %398 }
  0xfe   : > { %v400_v3 = vmul.f32 0.03125, %v399_v2 }
 0x100   : > { %v401_v5 = vsub.f32 %v1427_v0, %v400_v3 }
 0x102   : > { %v409_v6 = vmul.f32 %v813_v4, %v401_v5 }
 0x104   : > { %v410_v7 = vmul.f32 %v409_v6, %v409_v6 }
 0x106   : > { %411 = vadd.xlane.f32.xlu0 %v410_v7 }
 0x193   : > { %v412_v22 = vpop.xlane.xlu0 %411 }
 0x194   : > { %v413_v23 = vmul.f32 0.03125, %v412_v22 }
 0x196   : > { %v414_v24 = vadd.f32 1e-06, %v413_v23 }
 0x198   : > { %999 = vrsqrt.f32 %v414_v24 }
 0x1a2   : > { %v1000_v25 = vpop.eup %999 }
 0x1a3   : > { %v416_v27 = vmul.f32 %v1000_v25, %v409_v6 }
 0x1a5   : > { %v424_v29 = vmul.f32 %v814_v26, %v416_v27 }
 0x1a7   : > { %v432_v30 = vadd.f32 %v815_v28, %v424_v29 }
 0x1a9   : > { %v433_v31 = vpack.c.bf16 %v432_v30, %v432_v30 }
 0x1ab   : > { %434 = vst [vmem:[#allocation2] sm:$0xf] %v433_v31 }
 0x1b2   : > { %v436_v32 = vld [vmem:[#allocation2] sm:$0xf] }
 0x1b3   : > { %873 = vmatmul.mubr.bf16.vlgmr.msra.gmra.mrb[0].mxu0 %v436_v32 }
 0x286   : > { %v542_v36 = vpop.f32.mrb[0].mxu0 }
 0x287   : > { %v543_v37 = vadd.f32 %v816_v35, %v542_v36  ;;  %v874_v38 = vpop.f32.mrb[1].mxu0 }
 0x288   : > { %v545_v39 = vpop.f32.mrb[2].mxu0 }
 0x289   : > { %v548_v40 = vmax.f32 %v543_v37, 0.0  ;;  %v875_v41 = vpop.f32.mrb[3].mxu0 }
 0x28b   : > { %v550_v42 = vpack.c.bf16 %v548_v40, %v548_v40 }
 0x28d   : > { %893 = vmatmul.mubr.bf16.vlgmr.msra.gmra.mrb[0].mxu1 %v550_v42 }
 0x360   : > { %v649_v44 = vpop.f32.mrb[0].mxu1 }
 0x361   : > { %v668_v45 = vadd.f32 %v833_v43, %v649_v44  ;;  %v894_v46 = vpop.f32.mrb[1].mxu1 }
 0x362   : > { %v652_v47 = vpop.f32.mrb[2].mxu1 }
 0x363   : > { %v670_v48 = vadd.f32 %v668_v45, %v1427_v0  ;;  %v895_v49 = vpop.f32.mrb[3].mxu1 }
 0x365   : > { %671 = vst [vmem:[%s387_s12] sm:$0xff] %v670_v48 }
 0x366   : > { %1100 = shalt.err (!%p1097_p11)
}
 0x367   : > { %s1101_s25 = scalar_lea.hbm %s1471_s21, 128  ;;  %s1105_s26 = scalar_lea.hbm %s1549_s13, 256 }
 0x368   : > { %p1102_p0 = scmp.ne.s32.totalorder %s1471_s21, %s1101_s25  ;;  %p1106_p6 = scmp.lt.u32.totalorder %s1471_s21, %s1549_s13 }
 0x369   : > { %p1107_p7 = scmp.lt.u32.totalorder %s1105_s26, %s1101_s25  ;;  %p1109_p8 = scmp.lt.u32.totalorder %s1101_s25, %s1471_s21 }
 0x36a   : > { %p1103_p4 = pnand %p1102_p0, %p1550_p12 }
 0x36b   : > { %p1108_p2 = por %p1107_p7, %p1106_p6 }
 0x36c   : > { %p1104_p13 = pneg %p1103_p4 }
 0x36d   : > { %p1110_p1 = por %p1109_p8, %p1108_p2 }
 0x36f   : > { %p1111_p10 = pnand %p1110_p1, %p1104_p13 }
 0x371   : > { %1114 = shalt.err (!%p1111_p10)
}
 0x372   : > { %906 = dma.vmem_to_hbm [thread:$0]  (%p1550_p12), %s1473_s18, 128, %s1471_s21, %s673_s30  }
 0x373 PF: > { %s1551_s17 = sld [smem:[#allocation14_spill]]  ;;  %s1552_s15 = sld [smem:[#allocation15_spill]] }
 0x374   : > { %p1554_p5 = scmp.ge.s32.totalorder %s1173_s10, 2 }
 0x379   : > { %s698_s23 = sand.u32 1, %s1551_s17   ;;  %p1553_p3 = scmp.ne.s32.totalorder %s1552_s15, 0 }
 0x37a   : > { %s699_s19 = scalar_lea.sflag [#allocation6], %s698_s23 }
 0x37b   : > { %p920_p9 = pnand %p1554_p5, %p1553_p3 }
 0x37d   : > { %1148 = dma.done.wait (!%p920_p9), %s699_s19, 128  }
 0x37e   : > { %1150 = vsyncadd (!%p920_p9), %s699_s19, 4294967168  ;;  %s25_s10 = sadd.s32 1, %s1173_s10   ;;  %s1555_s27 = smov %s1157_s28 }
 0x37f   : > { %p22_p11 = scmp.ge.s32.totalorder %s25_s10, 4   ;;  %s1556_s28 = smov %s1161_s29 }
 0x380   : > { %s1557_s29 = smov %s1370_s24  ;;  %s1558_s30 = smov %s1169_s9 }
 0x381   : > { %s1559_s9 = smov %s1561_s16  ;;  %24 = sbr.rel (!%p22_p11) target bundleno = 9 (0x9), region = 118 }
 0x388   :  { %704 = vsyncpa [#allocation5], 1 }
 0x389   :  { %706 = vsyncpa [#allocation5 + $0x1], 1 }
 0x38a   :  { %707 = vsyncpa [#allocation8], 1 }
 0x38b   :  { %708 = vsyncpa [#allocation6], 1 }
 0x38c   :  { %710 = vsyncpa [#allocation6 + $0x1], 1 }

// kernel: tpu_custom_call.1
= control target key start
LH: loop header
LB: loop body
LE: loop exit
PB: predicated region body
PF: predicated region fallthrough
CT: control target
= control target key end

     0   :  { %s1520_s0 = inlined_call_operand.hbm [shape: f32[16,128], index: 0, kind: input, shape index: {}]   ;;  %s1521_s1 = inlined_call_operand.vmem [shape: f32[1,128], index: 1, kind: input, shape index: {}]   ;;  %s1522_s2 = inlined_call_operand.vmem [shape: f32[1,128], index: 2, kind: input, shape index: {}]   ;;  %s1523_s3 = inlined_call_operand.vmem [shape: f32[1,128], index: 3, kind: input, shape index: {}]   ;;  %s1524_s4 = inlined_call_operand.hbm [shape: bf16[128,128], index: 4, kind: input, shape index: {}]   ;;  %s1525_s5 = inlined_call_operand.vmem [shape: f32[1,128], index: 5, kind: input, shape index: {}]   ;;  %s1526_s6 = inlined_call_operand.hbm [shape: bf16[128,128], index: 6, kind: input, shape index: {}]   ;;  %s1527_s7 = inlined_call_operand.vmem [shape: f32[1,128], index: 7, kind: input, shape index: {}]   ;;  %s1528_s8 = inlined_call_operand.hbm [shape: f32[16,128], index: 8, kind: output, shape index: {}]  }
   0x1   :  { %1536 = sst [smem:[#allocation16_spill]] %s1528_s8 }
   0x2   :  { %13 = vsyncpa [#allocation5], 0 }
   0x3   :  { %15 = vsyncpa [#allocation5 + $0x1], 0 }
   0x4   :  { %16 = vsyncpa [#allocation8], 0 }
   0x5   :  { %17 = vsyncpa [#allocation6], 0 }
   0x6   :  { %19 = vsyncpa [#allocation6 + $0x1], 0  ;;  %s1228_s27 = smov 0   ;;  %s1230_s28 = smov 0  }
   0x7   :  { %s1232_s29 = smov 0   ;;  %s1234_s30 = smov 0  }
   0x8   :  { %s1236_s9 = smov 0   ;;  %s1238_s10 = smov 0  }
   0x9 LB: > { %1537 = sst [smem:[#allocation14_spill]] %s1153_s27  ;;  %s799_s11 = sadd.s32 4294967295, %s1173_s10   ;;  %s1173_s10 = sphi %s1238_s10, %s25_s10   ;;  %s1169_s9 = sphi %s1236_s9, %s1559_s9   ;;  %s1165_s30 = sphi %s1234_s30, %s1558_s30   ;;  %s1161_s29 = sphi %s1232_s29, %s1557_s29   ;;  %s1157_s28 = sphi %s1230_s28, %s1556_s28   ;;  %s1153_s27 = sphi %s1228_s27, %s1555_s27  }
   0xa   : > { %s800_s12 = sadd.s32 4294967294, %s1173_s10   ;;  %p57_p0 = scmp.ne.s32.totalorder %s1157_s28, %s1153_s27 }
   0xb   : > { %p1262_p1 = scmp.eq.s32.totalorder %s799_s11, 0  ;;  %p1266_p2 = scmp.eq.s32.totalorder %s799_s11, 1 }
   0xc   : > { %p249_p3 = scmp.eq.s32.totalorder %s800_s12, 1  ;;  %p801_p5 = scmp.ge.s32.totalorder %s1173_s10, 1 }
   0xd   : > { %s1538_s13 = scalar_select %p1262_p1, 1, 0 }
   0xe   : > { %p1272_p4 = por %p1262_p1, %p57_p0  ;;  %p1277_p6 = por %p249_p3, %p57_p0 }
   0xf   : > { %p256_p7 = scmp.lt.s32.totalorder %s1173_s10, 3  ;;  %s1175_s18 = smov [#allocation7]  }
  0x10   : > { %s1540_s15 = scalar_select %p1272_p4, 1, 0 }
  0x11   : > { %s1541_s16 = scalar_select %p1277_p6, 1, 0 }
  0x12   : > { %p1282_p8 = pnand %p801_p5, %p256_p7  ;;  %s279_s19 = sshll.u32 %s1175_s18, 4  ;;  %s1286_s19 = int_to_ptr.vmem [resolvable:$true] %s279_s19 }
  0x13   : > { %1542 = sst [smem:[#allocation15_spill]] %s1541_s16  ;;  %s1176_s21 = smov [#allocation9]  }
  0x14   : > { %p908_p9 = pneg %p1282_p8  ;;  %s301_s22 = sshll.u32 %s1176_s21, 4  ;;  %s1297_s22 = int_to_ptr.vmem [resolvable:$true] %s301_s22 }
  0x15   : > { %s1001_s25 = scalar_lea.hbm %s1524_s4, 1024 }
  0x16   : > { %p1293_p11 = pnand %p908_p9, %p1262_p1  ;;  %p1002_p12 = scmp.ne.s32.totalorder %s1524_s4, %s1001_s25 }
  0x17   : > { %p1008_p5 = scmp.lt.u32.totalorder %s1001_s25, %s1524_s4 }
  0x18   : > { %p1003_p13 = pneg %p1293_p11 }
  0x1a   : > { %p1004_p0 = pnand %p1003_p13, %p1002_p12 }
  0x1c   : > { %p1005_p3 = pneg %p1004_p0 }
  0x1e   : > { %p1010_p7 = pnand %p1008_p5, %p1005_p3 }
  0x20   : > { %1013 = shalt.err (!%p1010_p7)
}
  0x21   : > { %s1014_s21 = scalar_lea.vmem %s1286_s19, 1024  ;;  %p1022_p1 = scmp.lt.s32.totalorder %s1286_s19, %s1286_s19 }
  0x22   : > { %p1015_p9 = scmp.ne.s32.totalorder %s1286_s19, %s1014_s21  ;;  %p1023_p12 = scmp.lt.s32.totalorder %s1014_s21, %s1014_s21 }
  0x24   : > { %p1017_p10 = pnand %p1015_p9, %p1003_p13  ;;  %p1024_p0 = por %p1023_p12, %p1022_p1 }
  0x26   : > { %p1018_p6 = pneg %p1017_p10 }
  0x28   : > { %p1025_p4 = pnand %p1024_p0, %p1018_p6 }
  0x2a   : > { %1028 = shalt.err (!%p1025_p4)
}
  0x2b   : > { %s1177_s23 = smov 64   ;;  %s1178_s24 = smov 4  }
  0x2c   : > { %911 = dma.hbm_to_vmem [thread:$0]  (!%p1293_p11), %s1524_s4, 1024, %s1286_s19, [#allocation8], %s1177_s23, %s1177_s23, %s1178_s24  }
  0x2d   : > { %s1029_s18 = scalar_lea.hbm %s1526_s6, 1024 }
  0x2e   : > { %p1030_p1 = scmp.ne.s32.totalorder %s1526_s6, %s1029_s18  ;;  %p1036_p10 = scmp.lt.u32.totalorder %s1029_s18, %s1526_s6 }
  0x30   : > { %p1032_p4 = pnand %p1030_p1, %p1003_p13 }
  0x32   : > { %p1033_p6 = pneg %p1032_p4 }
  0x34   : > { %p1038_p3 = pnand %p1036_p10, %p1033_p6 }
  0x36   : > { %1041 = shalt.err (!%p1038_p3)
}
  0x37   : > { %s1042_s19 = scalar_lea.vmem %s1297_s22, 1024  ;;  %p1050_p12 = scmp.lt.s32.totalorder %s1297_s22, %s1297_s22 }
  0x38   : > { %p1043_p5 = scmp.ne.s32.totalorder %s1297_s22, %s1042_s19  ;;  %p1051_p0 = scmp.lt.s32.totalorder %s1042_s19, %s1042_s19 }
  0x3a   : > { %p1045_p7 = pnand %p1043_p5, %p1003_p13  ;;  %p1052_p1 = por %p1051_p0, %p1050_p12 }
  0x3c   : > { %p1046_p9 = pneg %p1045_p7 }
  0x3e   : > { %p1053_p4 = pnand %p1052_p1, %p1046_p9 }
  0x40   : > { %1056 = shalt.err (!%p1053_p4)
}
  0x41   : > { %914 = dma.hbm_to_vmem [thread:$0]  (!%p1293_p11), %s1526_s6, 1024, %s1297_s22, [#allocation8], %s1177_s23, %s1177_s23, %s1178_s24  }
  0x42   : > { %s37_s16 = sadd.s32 1, %s1169_s9  ;;  %s44_s25 = sadd.s32 1, %s1161_s29 }
  0x43   : > { %p39_p13 = scmp.ge.s32.totalorder %s37_s16, 2  ;;  %p51_p6 = scmp.ne.s32.totalorder %s1161_s29, %s1157_s28 }
  0x44   : > { %p52_p10 = scmp.eq.s32.totalorder %s1173_s10, 0  ;;  %p925_p3 = scmp.lt.s32.totalorder %s1173_s10, 2 }
  0x45   : > { %s1561_s16 = smov (%p39_p13, %s37_s16), 0  ;;  %p1361_p7 = por %p1266_p2, %p51_p6 }
  0x46   : > { %p53_p5 = por %p52_p10, %p51_p6  ;;  %s41_s26 = ssub.s32 %s1169_s9, %s1561_s16 }
  0x47   : > { %s1545_s20 = scalar_select %p1361_p7, 1, 0 }
  0x48   : > { %s318_s11 = sand.u32 1, %s1161_s29   ;;  %p42_p9 = scmp.eq.s32.totalorder %s41_s26, 0 }
  0x49   : > { %s806_s22 = sshll.u32 %s318_s11, 3  ;;  %s807_s23 = sshll.u32 %s1169_s9, 7 }
  0x4a   : > { %s1370_s24 = scalar_select %p42_p9, %s1161_s29, %s44_s25  }
  0x4b   : > { %s1375_s21 = scalar_lea.hbm %s1520_s0, %s807_s23  ;;  %s322_s14 = scalar_lea.vmem [#allocation4], %s806_s22 }
  0x4c   : > { %s329_s19 = sshll.u32 %s322_s14, 4  ;;  %p1379_p2 = pnand %p925_p3, %p53_p5  ;;  %s1383_s19 = int_to_ptr.vmem [resolvable:$true] %s329_s19 }
  0x4d   : > { %s319_s27 = scalar_lea.sflag [#allocation5], %s318_s11  ;;  %s1057_s25 = scalar_lea.hbm %s1375_s21, 128 }
  0x4e   : > { %p1058_p11 = scmp.ne.s32.totalorder %s1375_s21, %s1057_s25  ;;  %p1059_p12 = pneg %p1379_p2 }
  0x4f   : > { %s1062_s23 = scalar_lea.hbm %s1520_s0, 256  ;;  %p1063_p4 = scmp.lt.u32.totalorder %s1375_s21, %s1520_s0 }
  0x50   : > { %p1060_p0 = pnand %p1059_p12, %p1058_p11  ;;  %p1064_p13 = scmp.lt.u32.totalorder %s1062_s23, %s1057_s25 }
  0x51   : > { %p1066_p10 = scmp.lt.u32.totalorder %s1057_s25, %s1375_s21 }
  0x52   : > { %p1061_p1 = pneg %p1060_p0  ;;  %p1065_p6 = por %p1064_p13, %p1063_p4 }
  0x54   : > { %p1067_p3 = por %p1066_p10, %p1065_p6 }
  0x56   : > { %p1068_p5 = pnand %p1067_p3, %p1061_p1 }
  0x58   : > { %1071 = shalt.err (!%p1068_p5)
}
  0x59   : > { %s1072_s11 = scalar_lea.vmem %s1383_s19, 128  ;;  %s1179_s14 = smov [#allocation4]  }
  0x5a   : > { %p1073_p9 = scmp.ne.s32.totalorder %s1383_s19, %s1072_s11  ;;  %s1077_s26 = sshll.u32 %s1179_s14, 4  ;;  %s1078_s26 = int_to_ptr.vmem [resolvable:$false] %s1077_s26 }
  0x5b   : > { %s1079_s22 = scalar_lea.vmem %s1078_s26, 256  ;;  %p1080_p7 = scmp.lt.s32.totalorder %s1383_s19, %s1078_s26 }
  0x5c   : > { %p1075_p11 = pnand %p1073_p9, %p1059_p12  ;;  %p1081_p4 = scmp.lt.s32.totalorder %s1079_s22, %s1072_s11 }
  0x5e   : > { %p1076_p0 = pneg %p1075_p11  ;;  %p1082_p13 = por %p1081_p4, %p1080_p7 }
  0x60   : > { %p1083_p6 = pnand %p1082_p13, %p1076_p0 }
  0x62   : > { %1086 = shalt.err (!%p1083_p6)
}
  0x63   : > { %918 = dma.hbm_to_vmem [thread:$0]  (!%p1379_p2), %s1375_s21, 128, %s1383_s19, %s319_s27  }
  0x64   : > { %338 = sbr.rel (%p1282_p8) target bundleno = 883 (0x373), region = 52  ;;  %s1413_s25 = sand.u32 (!%p1282_p8), 1, %s1157_s28  }
  0x65   : > { %s809_s23 = sshll.u32 (!%p1282_p8), %s1413_s25, 3  ;;  %s341_s12 = scalar_lea.sflag (!%p1282_p8), [#allocation5], %s1413_s25 }
  0x66   : > { %s344_s18 = scalar_lea.vmem (!%p1282_p8), [#allocation4], %s809_s23  ;;  %p1547_p7 = scmp.ne.s32.totalorder (!%p1282_p8), %s1540_s15, 0 }
  0x6b   : > { %1140 = dma.done.wait (%p1547_p7), %s341_s12, 128  }
  0x6c   : > { %1142 = vsyncadd (%p1547_p7), %s341_s12, 4294967168  ;;  %p1548_p2 = scmp.ne.s32.totalorder %s1538_s13, 0 }
  0x6e   : > { %1144 = dma.done.wait (%p1548_p2), [#allocation8], 2048  }
  0x6f   : > { %1146 = vsyncadd (%p1548_p2), [#allocation8], 4294965248  ;;  %v1427_v0 = vld [vmem:[%s344_s18] sm:$0xff]  ;;  %v1180_v1 = vmov 0.0   ;;  %v813_v4 = vld [vmem:[%s1521_s1] ss:$0 sm:$0xff] }
  0x70   : > { %398 = vadd.xlane.f32.xlu0 %v1427_v0  ;;  %856 = vmatprep.subr.bf16.mxu0 %v1180_v1  ;;  %v983_v8 = vld [vmem:[#allocation7] sm:$0xff]   ;;  %v984_v9 = vld [vmem:[#allocation7 + $0x8] sm:$0xff]   ;;  %v985_v10 = vld [vmem:[#allocation7 + $0x10] sm:$0xff]   ;;  %vm1181_vm0 = vmmov 0   ;;  %s835_s22 = sshll.u32 %s1165_s30, 7  ;;  %s387_s12 = scalar_lea.vmem [#allocation10], %s809_s23 }
  0x71   : > { %876 = vmatprep.subr.bf16.mxu1 %v1180_v1  ;;  %857 = vmatpush3.bf16.msra.mxu0 %v983_v8  ;;  %v986_v11 = vld [vmem:[#allocation7 + $0x18] sm:$0xff]   ;;  %v987_v12 = vld [vmem:[#allocation7 + $0x20] sm:$0xff]   ;;  %v988_v13 = vld [vmem:[#allocation7 + $0x28] sm:$0xff]   ;;  %s686_s18 = sshll.u32 %s387_s12, 4  ;;  %s1549_s13 = sld [smem:[#allocation16_spill]]  ;;  %s1473_s18 = int_to_ptr.vmem [resolvable:$true] %s686_s18 }
  0x72   : > { %858 = vmatprep.subr.bf16.mxu0 %v1180_v1  ;;  %v989_v14 = vld [vmem:[#allocation7 + $0x30] sm:$0xff]   ;;  %v990_v15 = vld [vmem:[#allocation7 + $0x38] sm:$0xff]   ;;  %872 = vmatprep.mubr.msk.bf16.mxu0 %vm1181_vm0, %v1180_v1  ;;  %v991_v16 = vld [vmem:[#allocation9] sm:$0xff]   ;;  %s673_s30 = scalar_lea.sflag [#allocation6], %s1413_s25  ;;  %s1087_s23 = scalar_lea.vmem %s1473_s18, 128 }
  0x73   : > { %892 = vmatprep.mubr.msk.bf16.mxu1 %vm1181_vm0, %v1180_v1  ;;  %877 = vmatpush3.bf16.msra.mxu1 %v991_v16  ;;  %v992_v17 = vld [vmem:[#allocation9 + $0x8] sm:$0xff]   ;;  %v993_v18 = vld [vmem:[#allocation9 + $0x10] sm:$0xff]   ;;  %v994_v19 = vld [vmem:[#allocation9 + $0x18] sm:$0xff]   ;;  %p1088_p8 = scmp.ne.s32.totalorder %s1473_s18, %s1087_s23  ;;  %p1550_p12 = scmp.ne.s32.totalorder %s1545_s20, 0 }
  0x74   : > { %878 = vmatprep.subr.bf16.mxu1 %v1180_v1  ;;  %v995_v20 = vld [vmem:[#allocation9 + $0x20] sm:$0xff]   ;;  %v996_v21 = vld [vmem:[#allocation9 + $0x28] sm:$0xff]   ;;  %v997_v33 = vld [vmem:[#allocation9 + $0x30] sm:$0xff]   ;;  %s1182_s19 = smov [#allocation10]  }
  0x75   : > { %859 = vmatpush3.bf16.msra.mxu0 %v984_v9  ;;  %v814_v26 = vld [vmem:[%s1522_s2] ss:$0 sm:$0xff]  ;;  %v998_v34 = vld [vmem:[#allocation9 + $0x38] sm:$0xff]   ;;  %p1089_p1 = pnand %p1088_p8, %p1550_p12  ;;  %s1091_s8 = sshll.u32 %s1182_s19, 4  ;;  %s1092_s8 = int_to_ptr.vmem [resolvable:$false] %s1091_s8 }
  0x76   : > { %860 = vmatprep.subr.bf16.mxu0 %v1180_v1  ;;  %v815_v28 = vld [vmem:[%s1523_s3] ss:$0 sm:$0xff]  ;;  %s1093_s27 = scalar_lea.vmem %s1092_s8, 256  ;;  %p1094_p3 = scmp.lt.s32.totalorder %s1473_s18, %s1092_s8 }
  0x77   : > { %879 = vmatpush3.bf16.msra.mxu1 %v992_v17  ;;  %v816_v35 = vld [vmem:[%s1525_s5] ss:$0 sm:$0xff]  ;;  %s1471_s21 = scalar_lea.hbm %s1549_s13, %s835_s22  ;;  %p1090_p10 = pneg %p1089_p1 }
  0x78   : > { %880 = vmatprep.subr.bf16.mxu1 %v1180_v1  ;;  %v833_v43 = vld [vmem:[%s1527_s7] ss:$0 sm:$0xff]  ;;  %p1095_p5 = scmp.lt.s32.totalorder %s1093_s27, %s1087_s23 }
  0x79   : > { %861 = vmatpush3.bf16.msra.mxu0 %v985_v10 }
  0x7a   : > { %862 = vmatprep.subr.bf16.mxu0 %v1180_v1  ;;  %p1096_p9 = por %p1095_p5, %p1094_p3 }
  0x7b   : > { %881 = vmatpush3.bf16.msra.mxu1 %v993_v18 }
  0x7c   : > { %882 = vmatprep.subr.bf16.mxu1 %v1180_v1  ;;  %p1097_p11 = pnand %p1096_p9, %p1090_p10 }
  0x7d   : > { %863 = vmatpush3.bf16.msra.mxu0 %v986_v11 }
  0x7e   : > { %864 = vmatprep.subr.bf16.mxu0 %v1180_v1 }
  0x7f   : > { %883 = vmatpush3.bf16.msra.mxu1 %v994_v19 }
  0x80   : > { %884 = vmatprep.subr.bf16.mxu1 %v1180_v1 }
  0x81   : > { %865 = vmatpush3.bf16.msra.mxu0 %v987_v12 }
  0x82   : > { %866 = vmatprep.subr.bf16.mxu0 %v1180_v1 }
  0x83   : > { %885 = vmatpush3.bf16.msra.mxu1 %v995_v20 }
  0x84   : > { %886 = vmatprep.subr.bf16.mxu1 %v1180_v1 }
  0x85   : > { %867 = vmatpush3.bf16.msra.mxu0 %v988_v13 }
  0x86   : > { %868 = vmatprep.subr.bf16.mxu0 %v1180_v1 }
  0x87   : > { %887 = vmatpush3.bf16.msra.mxu1 %v996_v21 }
  0x88   : > { %888 = vmatprep.subr.bf16.mxu1 %v1180_v1 }
  0x89   : > { %869 = vmatpush3.bf16.msra.mxu0 %v989_v14 }
  0x8a   : > { %870 = vmatprep.subr.bf16.mxu0 %v1180_v1 }
  0x8b   : > { %889 = vmatpush3.bf16.msra.mxu1 %v997_v33 }
  0x8c   : > { %890 = vmatprep.subr.bf16.mxu1 %v1180_v1 }
  0x8d   : > { %871 = vmatpush3.bf16.msra.mxu0 %v990_v15 }
  0x8f   : > { %891 = vmatpush3.bf16.msra.mxu1 %v998_v34 }
  0xfd   : > { %v399_v2 = vpop.xlane.xlu0 %398 }
  0xfe   : > { %v400_v3 = vmul.f32 0.03125, %v399_v2 }
 0x100   : > { %v401_v5 = vsub.f32 %v1427_v0, %v400_v3 }
 0x102   : > { %v409_v6 = vmul.f32 %v813_v4, %v401_v5 }
 0x104   : > { %v410_v7 = vmul.f32 %v409_v6, %v409_v6 }
 0x106   : > { %411 = vadd.xlane.f32.xlu0 %v410_v7 }
 0x193   : > { %v412_v22 = vpop.xlane.xlu0 %411 }
 0x194   : > { %v413_v23 = vmul.f32 0.03125, %v412_v22 }
 0x196   : > { %v414_v24 = vadd.f32 1e-06, %v413_v23 }
 0x198   : > { %999 = vrsqrt.f32 %v414_v24 }
 0x1a2   : > { %v1000_v25 = vpop.eup %999 }
 0x1a3   : > { %v416_v27 = vmul.f32 %v1000_v25, %v409_v6 }
 0x1a5   : > { %v424_v29 = vmul.f32 %v814_v26, %v416_v27 }
 0x1a7   : > { %v432_v30 = vadd.f32 %v815_v28, %v424_v29 }
 0x1a9   : > { %v433_v31 = vpack.c.bf16 %v432_v30, %v432_v30 }
 0x1ab   : > { %434 = vst [vmem:[#allocation2] sm:$0xf] %v433_v31 }
 0x1b2   : > { %v436_v32 = vld [vmem:[#allocation2] sm:$0xf] }
 0x1b3   : > { %873 = vmatmul.mubr.bf16.vlgmr.msra.gmra.mrb[0].mxu0 %v436_v32 }
 0x286   : > { %v542_v36 = vpop.f32.mrb[0].mxu0 }
 0x287   : > { %v543_v37 = vadd.f32 %v816_v35, %v542_v36  ;;  %v874_v38 = vpop.f32.mrb[1].mxu0 }
 0x288   : > { %v545_v39 = vpop.f32.mrb[2].mxu0 }
 0x289   : > { %v548_v40 = vmax.f32 %v543_v37, 0.0  ;;  %v875_v41 = vpop.f32.mrb[3].mxu0 }
 0x28b   : > { %v550_v42 = vpack.c.bf16 %v548_v40, %v548_v40 }
 0x28d   : > { %893 = vmatmul.mubr.bf16.vlgmr.msra.gmra.mrb[0].mxu1 %v550_v42 }
 0x360   : > { %v649_v44 = vpop.f32.mrb[0].mxu1 }
 0x361   : > { %v668_v45 = vadd.f32 %v833_v43, %v649_v44  ;;  %v894_v46 = vpop.f32.mrb[1].mxu1 }
 0x362   : > { %v652_v47 = vpop.f32.mrb[2].mxu1 }
 0x363   : > { %v670_v48 = vadd.f32 %v668_v45, %v1427_v0  ;;  %v895_v49 = vpop.f32.mrb[3].mxu1 }
 0x365   : > { %671 = vst [vmem:[%s387_s12] sm:$0xff] %v670_v48 }
 0x366   : > { %1100 = shalt.err (!%p1097_p11)
}
 0x367   : > { %s1101_s25 = scalar_lea.hbm %s1471_s21, 128  ;;  %s1105_s26 = scalar_lea.hbm %s1549_s13, 256 }
 0x368   : > { %p1102_p0 = scmp.ne.s32.totalorder %s1471_s21, %s1101_s25  ;;  %p1106_p6 = scmp.lt.u32.totalorder %s1471_s21, %s1549_s13 }
 0x369   : > { %p1107_p7 = scmp.lt.u32.totalorder %s1105_s26, %s1101_s25  ;;  %p1109_p8 = scmp.lt.u32.totalorder %s1101_s25, %s1471_s21 }
 0x36a   : > { %p1103_p4 = pnand %p1102_p0, %p1550_p12 }
 0x36b   : > { %p1108_p2 = por %p1107_p7, %p1106_p6 }
 0x36c   : > { %p1104_p13 = pneg %p1103_p4 }
 0x36d   : > { %p1110_p1 = por %p1109_p8, %p1108_p2 }
 0x36f   : > { %p1111_p10 = pnand %p1110_p1, %p1104_p13 }
 0x371   : > { %1114 = shalt.err (!%p1111_p10)
}
 0x372   : > { %906 = dma.vmem_to_hbm [thread:$0]  (%p1550_p12), %s1473_s18, 128, %s1471_s21, %s673_s30  }
 0x373 PF: > { %s1551_s17 = sld [smem:[#allocation14_spill]]  ;;  %s1552_s15 = sld [smem:[#allocation15_spill]] }
 0x374   : > { %p1554_p5 = scmp.ge.s32.totalorder %s1173_s10, 2 }
 0x379   : > { %s698_s23 = sand.u32 1, %s1551_s17   ;;  %p1553_p3 = scmp.ne.s32.totalorder %s1552_s15, 0 }
 0x37a   : > { %s699_s19 = scalar_lea.sflag [#allocation6], %s698_s23 }
 0x37b   : > { %p920_p9 = pnand %p1554_p5, %p1553_p3 }
 0x37d   : > { %1148 = dma.done.wait (!%p920_p9), %s699_s19, 128  }
 0x37e   : > { %1150 = vsyncadd (!%p920_p9), %s699_s19, 4294967168  ;;  %s25_s10 = sadd.s32 1, %s1173_s10   ;;  %s1555_s27 = smov %s1157_s28 }
 0x37f   : > { %p22_p11 = scmp.ge.s32.totalorder %s25_s10, 4   ;;  %s1556_s28 = smov %s1161_s29 }
 0x380   : > { %s1557_s29 = smov %s1370_s24  ;;  %s1558_s30 = smov %s1169_s9 }
 0x381   : > { %s1559_s9 = smov %s1561_s16  ;;  %24 = sbr.rel (!%p22_p11) target bundleno = 9 (0x9), region = 118 }
 0x388   :  { %704 = vsyncpa [#allocation5], 1 }
 0x389   :  { %706 = vsyncpa [#allocation5 + $0x1], 1 }
 0x38a   :  { %707 = vsyncpa [#allocation8], 1 }
 0x38b   :  { %708 = vsyncpa [#allocation6], 1 }
 0x38c   :  { %710 = vsyncpa [#allocation6 + $0x1], 1 }

</bundles_post_ra>
